<compile_context>
chip_gen: v5e
topology: v5e:2x2
jax: 0.10.0
libtpu: 0.0.40
codegen_flags: <defaults>
</compile_context>

<pallas_src>
import jax
import jax.numpy as jnp
from jax.experimental import pallas as pl
from jax.experimental.pallas import tpu as pltpu


def _conv1x1_fuse_kernel(w_ref, xa_ref, res_ref, o_ref):
    """o = res + W @ xa   (1x1 conv, no bias, fused with the residual add).

    w_ref   : (Cout, Cin)       weight (f32), resident across the whole grid
    xa_ref  : (1, Cin, tile_n)  pixel tile of x_assa, native f32, NCHW order
    res_ref : (1, Cout, tile_n) residual tile
    o_ref   : (1, Cout, tile_n) output tile, lane-dense along the pixel dim

    The bf16 cast for the MXU happens here, in-register, so x_assa travels
    HBM->VMEM exactly once in its native dtype (no extra convert pass).
    Accumulation and the residual add stay in f32.
    """
    w = w_ref[...].astype(jnp.bfloat16)
    xa = xa_ref[0].astype(jnp.bfloat16)
    y = jnp.dot(w, xa, preferred_element_type=jnp.float32)
    o_ref[0] = (res_ref[0].astype(jnp.float32) + y).astype(o_ref.dtype)


def _pick_tile_n(n, cin, cout, in_bytes, res_bytes, out_bytes,
                 *, vmem_budget=12 << 20, cap=8192):
    """Largest pixel tile (multiple of 128, preferring divisors of n) that
    keeps the double-buffered working set under a conservative VMEM budget
    (fits the 16 MiB v5e scoped-VMEM default; well under v6e/v7x budgets).
    The 8192-column cap amortizes the ~0.35us per-grid-step overhead."""
    if n <= 128:
        return n
    # double-buffered x_assa + residual + output tiles (bytes per pixel col)
    per_col = 2 * (cin * in_bytes + cout * res_bytes + cout * out_bytes)
    max_t = min(cap, max(128, vmem_budget // per_col), n)
    max_t = max(128, (max_t // 128) * 128)
    for t in range(max_t, 127, -128):       # prefer an even split of n
        if n % t == 0:
            return t
    return max_t                             # ragged last block is masked


def change_channel_fusion(x_assa_nchw, w_oc_ic, ori_x_nchw, *, out_dtype=None):
    """Pallas implementation of `ori_x + Conv2d_1x1(x_assa)` (bias=False).

    x_assa_nchw : [B, Cin, H, W]   ASSA output (Cin = 24 * new_in_chans)
    w_oc_ic     : [Cout, Cin]      Conv2d 1x1 weight squeezed (Cout = band)
    ori_x_nchw  : [B, Cout, H, W]  original swin input (residual)
    out_dtype   : output HBM dtype; default = ori_x dtype.  Pass bf16 here
                  (and feed a bf16 residual) if the swin backbone consumes
                  bf16 -- it cuts residual+output HBM traffic in half.
    returns     : [B, Cout, H, W]
    """
    B, Cin, H, W = x_assa_nchw.shape
    Cout = w_oc_ic.shape[0]
    N = H * W
    out_dtype = ori_x_nchw.dtype if out_dtype is None else jnp.dtype(out_dtype)

    # NCHW kept as-is: merging the trailing H,W dims is a free reshape
    # (no transpose / extra HBM pass), and no dtype convert is issued here.
    xa = x_assa_nchw.reshape(B, Cin, N)
    res = ori_x_nchw.reshape(B, Cout, N)
    w = w_oc_ic

    in_bytes = jnp.dtype(xa.dtype).itemsize
    res_bytes = jnp.dtype(res.dtype).itemsize
    out_bytes = jnp.dtype(out_dtype).itemsize

    tile_n = _pick_tile_n(N, Cin, Cout, in_bytes, res_bytes, out_bytes)
    # v7x megacore: guarantee >= 2 parallel grid steps so no TensorCore idles.
    if B * pl.cdiv(N, tile_n) < 2 and N >= 256:
        tile_n = max(128, ((N // 2) // 128) * 128)
    tiles = pl.cdiv(N, tile_n)

    cost = pl.CostEstimate(
        flops=2 * B * N * Cin * Cout,
        transcendentals=0,
        bytes_accessed=(B * N * Cin * in_bytes                 # x_assa read
                        + Cout * Cin * jnp.dtype(w.dtype).itemsize  # weight
                        + B * N * Cout * (res_bytes + out_bytes)),  # res + out
    )

    # The larger parallel axis leads the grid (megacore-friendly).  Packing
    # several batches per block is only worthwhile when B*tiles is large and
    # each step moves only tens of KiB; at these sizes it would be a no-op.
    if tiles >= B:
        grid = (tiles, B)

        def io_map(j, b):
            return (b, 0, j)

        def w_map(j, b):
            return (0, 0)
    else:
        grid = (B, tiles)

        def io_map(b, j):
            return (b, 0, j)

        def w_map(b, j):
            return (0, 0)

    out_flat = pl.pallas_call(
        _conv1x1_fuse_kernel,
        out_shape=jax.ShapeDtypeStruct((B, Cout, N), out_dtype),
        grid=grid,
        in_specs=[
            # Weight: constant across the grid -> stays VMEM-resident.
            pl.BlockSpec((Cout, Cin), w_map),
            # x_assa: one batch, all channels, one pixel tile (native dtype).
            pl.BlockSpec((1, Cin, tile_n), io_map),
            # residual: matching output tile.
            pl.BlockSpec((1, Cout, tile_n), io_map),
        ],
        out_specs=pl.BlockSpec((1, Cout, tile_n), io_map),
        compiler_params=pltpu.CompilerParams(
            # Both axes are independent -> megacore sharding on v7x.
            dimension_semantics=("parallel", "parallel")),
        cost_estimate=cost,
    )(w, xa, res)

    return out_flat.reshape(B, Cout, H, W)


class MyNetPallas:
    """JAX/Pallas port of MyNet (attention + fusion branch)."""

    def __init__(self, band, key):
        self.band = band
        new_in_chans = (band - 7) // 2 + 1
        self.cin = 24 * new_in_chans
        # nn.Conv2d(24*new_in_chans, band, kernel_size=(1,1), bias=False)
        # deterministic init (kaiming-like scale), weight shape [Cout, Cin].
        self.change_channel_w = (
            jax.random.normal(key, (band, self.cin), jnp.float32)
            / jnp.sqrt(jnp.float32(self.cin))
        )

    def forward(self, x, x_assa):
        # x      : [B, band, pixel_patch, pixel_patch]            (ori_x)
        # x_assa : [B, 24*new_in_chans, pixel_patch, pixel_patch] (ASSA out)
        fused = change_channel_fusion(x_assa, self.change_channel_w, x)
        # TODO(synk): swin_tiny_patch4_window7_224 backbone definition not
        # provided; returning the fused feature map that would feed it.
        return fused


if __name__ == "__main__":
    key = jax.random.PRNGKey(0)
    k_w, k_x, k_a = jax.random.split(key, 3)

    band = 16                    # spectral bands (Cout of change_channel)
    pixel_patch = 16             # spatial size -> H*W = 256 (lane-dense)
    batch = 2
    new_in_chans = (band - 7) // 2 + 1
    cin = 24 * new_in_chans      # 120

    x = jax.random.normal(k_x, (batch, band, pixel_patch, pixel_patch),
                          jnp.float32)
    x_assa = jax.random.normal(k_a, (batch, cin, pixel_patch, pixel_patch),
                               jnp.float32)

    net = MyNetPallas(band, k_w)
    out = jax.block_until_ready(net.forward(x, x_assa))
    assert out.shape == (batch, band, pixel_patch, pixel_patch)
    assert out.dtype == x.dtype

    # Reference 1: same bf16-rounded MXU operands, f32 accumulation (tight).
    w_b = net.change_channel_w.astype(jnp.bfloat16).astype(jnp.float32)
    xa_b = x_assa.astype(jnp.bfloat16).astype(jnp.float32)
    ref_bf16 = x + jnp.einsum("oc,bchw->bohw", w_b, xa_b)
    assert jnp.allclose(out, ref_bf16, atol=2e-2, rtol=2e-2), \
        "mismatch vs bf16-operand reference"

    # Reference 2: original module semantics in full f32 (loose tolerance to
    # account for the in-kernel bf16 MXU operand rounding).
    ref_f32 = x + jnp.einsum("oc,bchw->bohw", net.change_channel_w, x_assa)
    assert jnp.allclose(out, ref_f32, atol=1e-1, rtol=5e-2), \
        "mismatch vs f32 reference"

    print("KERNEL_OK")
</pallas_src>

<mosaic_0001>
module attributes {stable_mosaic.version = 11 : i64} {
  func.func @_conv1x1_fuse_kernel(%arg0: i32, %arg1: i32, %arg2: memref<16x120xf32, #tpu.memory_space<vmem>>, %arg3: memref<1x120x256xf32, #tpu.memory_space<vmem>>, %arg4: memref<1x16x256xf32, #tpu.memory_space<vmem>>, %arg5: memref<1x16x256xf32, #tpu.memory_space<vmem>>) attributes {dimension_semantics = [#tpu.dimension_semantics<parallel>, #tpu.dimension_semantics<parallel>], iteration_bounds = array<i64: 2, 1>, scalar_prefetch = 0 : i64, scratch_operands = 0 : i64, tpu.core_type = #tpu.core_type<tc>, window_params = [{pipeline_mode = #tpu.pipeline_mode<synchronous>, transform_indices = @transform_0, window_bounds = array<i64: 16, 120>}, {transform_indices = @transform_1, window_bounds = array<i64: 1, 120, 256>}, {transform_indices = @transform_2, window_bounds = array<i64: 1, 16, 256>}, {transform_indices = @transform_3, window_bounds = array<i64: 1, 16, 256>}]} {
    %c0 = arith.constant 0 : index
    %c0_0 = arith.constant 0 : index
    %0 = vector.load %arg2[%c0, %c0_0] : memref<16x120xf32, #tpu.memory_space<vmem>>, vector<16x120xf32>
    %1 = arith.truncf %0 : vector<16x120xf32> to vector<16x120xbf16>
    %c0_1 = arith.constant 0 : index
    %c0_2 = arith.constant 0 : index
    %c0_3 = arith.constant 0 : index
    %2 = vector.load %arg3[%c0_1, %c0_2, %c0_3] : memref<1x120x256xf32, #tpu.memory_space<vmem>>, vector<1x120x256xf32>
    %3 = vector.shape_cast %2 : vector<1x120x256xf32> to vector<120x256xf32>
    %4 = arith.truncf %3 : vector<120x256xf32> to vector<120x256xbf16>
    %cst = arith.constant dense<0.000000e+00> : vector<16x256xf32>
    %5 = tpu.matmul %1, %4, %cst {dimension_numbers = #tpu.dot_dimension_numbers<[1], [0], [0], [1], [0, 0, 1, 1], [], []>} : vector<16x120xbf16>, vector<120x256xbf16>, vector<16x256xf32> -> vector<16x256xf32>
    %c0_4 = arith.constant 0 : index
    %c0_5 = arith.constant 0 : index
    %c0_6 = arith.constant 0 : index
    %6 = vector.load %arg4[%c0_4, %c0_5, %c0_6] : memref<1x16x256xf32, #tpu.memory_space<vmem>>, vector<1x16x256xf32>
    %7 = vector.shape_cast %6 : vector<1x16x256xf32> to vector<16x256xf32>
    %8 = arith.addf %7, %5 : vector<16x256xf32>
    %c0_7 = arith.constant 0 : index
    %c0_8 = arith.constant 0 : index
    %c0_9 = arith.constant 0 : index
    %9 = vector.load %arg5[%c0_7, %c0_8, %c0_9] : memref<1x16x256xf32, #tpu.memory_space<vmem>>, vector<1x16x256xf32>
    %10 = vector.shape_cast %9 : vector<1x16x256xf32> to vector<16x256xf32>
    %11 = vector.shape_cast %8 : vector<16x256xf32> to vector<1x16x256xf32>
    tpu.vector_store %arg5[%c0_7, %c0_8, %c0_9], %11 {strides = array<i32>} : memref<1x16x256xf32, #tpu.memory_space<vmem>>, vector<1x16x256xf32>,
    return
  }
  func.func @transform_0(%arg0: i32, %arg1: i32) -> (i32, i32) {
    %c0_i32 = arith.constant 0 : i32
    %c0_i32_0 = arith.constant 0 : i32
    %c0_i32_1 = arith.constant 0 : i32
    return %c0_i32, %c0_i32_0 : i32, i32
  }
  func.func @transform_1(%arg0: i32, %arg1: i32) -> (i32, i32, i32) {
    %c0_i32 = arith.constant 0 : i32
    %c0_i32_0 = arith.constant 0 : i32
    return %arg0, %c0_i32, %arg1 : i32, i32, i32
  }
  func.func @transform_2(%arg0: i32, %arg1: i32) -> (i32, i32, i32) {
    %c0_i32 = arith.constant 0 : i32
    %c0_i32_0 = arith.constant 0 : i32
    return %arg0, %c0_i32, %arg1 : i32, i32, i32
  }
  func.func @transform_3(%arg0: i32, %arg1: i32) -> (i32, i32, i32) {
    %c0_i32 = arith.constant 0 : i32
    %c0_i32_0 = arith.constant 0 : i32
    return %arg0, %c0_i32, %arg1 : i32, i32, i32
  }
}

</mosaic_0001>

<bundles_post_ra>
// kernel: tpu_custom_call.1
= control target key start
LH: loop header
LB: loop body
LE: loop exit
PB: predicated region body
PF: predicated region fallthrough
CT: control target
= control target key end

     0   :  { %s1025_s0 = inlined_call_operand.hbm [shape: f32[16,120], index: 0, kind: input, shape index: {}]   ;;  %s1026_s1 = inlined_call_operand.hbm [shape: f32[2,120,256], index: 1, kind: input, shape index: {}]   ;;  %s1027_s2 = inlined_call_operand.hbm [shape: f32[2,16,256], index: 2, kind: input, shape index: {}]   ;;  %s1028_s3 = inlined_call_operand.hbm [shape: f32[2,16,256], index: 3, kind: output, shape index: {}]  }
   0x1   :  { %1032 = sst [smem:[#allocation13_spill]] %s1025_s0 }
   0x2   :  { %1033 = sst [smem:[#allocation14_spill]] %s1026_s1 }
   0x3   :  { %8 = vsyncpa [#allocation3], 0 }
   0x4   :  { %9 = vsyncpa [#allocation6], 0 }
   0x5   :  { %11 = vsyncpa [#allocation6 + $0x1], 0 }
   0x6   :  { %12 = vsyncpa [#allocation4], 0 }
   0x7   :  { %14 = vsyncpa [#allocation4 + $0x1], 0  ;;  %s826_s12 = smov 0   ;;  %s828_s13 = smov 0  }
   0x8   :  { %s830_s14 = smov 0   ;;  %s832_s15 = smov 0  }
   0x9   :  { %s834_s16 = smov 0   ;;  %s836_s17 = smov 0  }
   0xa LB: > { %s32_s18 = sadd.s32 1, %s793_s16  ;;  %s62_s19 = sadd.s32 1, %s785_s14  ;;  %s797_s17 = sphi %s836_s17, %s20_s17   ;;  %s793_s16 = sphi %s834_s16, %s1049_s16   ;;  %s789_s15 = sphi %s832_s15, %s1048_s15   ;;  %s785_s14 = sphi %s830_s14, %s1047_s14   ;;  %s781_s13 = sphi %s828_s13, %s1046_s13   ;;  %s777_s12 = sphi %s826_s12, %s1045_s12  }
   0xb   : > { %p34_p0 = scmp.ge.s32.totalorder %s32_s18, 2  ;;  %p69_p1 = scmp.ne.s32.totalorder %s785_s14, %s781_s13 }
   0xc   : > { %p70_p2 = scmp.eq.s32.totalorder %s797_s17, 0  ;;  %p516_p3 = scmp.ge.s32.totalorder %s797_s17, 2 }
   0xd   : > { %s1051_s18 = smov (%p34_p0, %s32_s18), 0  ;;  %p563_p5 = scmp.lt.s32.totalorder %s797_s17, 2 }
   0xe   : > { %1034 = sst [smem:[#allocation12_spill]] %s1051_s18  ;;  %p71_p4 = por %p70_p2, %p69_p1 }
   0xf   : > { %s57_s20 = ssub.s32 %s793_s16, %s1051_s18  ;;  %s169_s21 = sand.u32 1, %s797_s17  }
  0x10   : > { %p60_p6 = scmp.eq.s32.totalorder %s57_s20, 0  ;;  %s171_s22 = sand.u32 1, %s785_s14  }
  0x11   : > { %s535_s23 = smul.u32 240, %s793_s16  ;;  %s1035_s1 = sld [smem:[#allocation14_spill]] }
  0x12   : > { %s874_s24 = scalar_select %p60_p6, %s785_s14, %s62_s19  }
  0x13   : > { %s534_s25 = smul.u32 240, %s171_s22  ;;  %p879_p7 = pnand %p563_p5, %p71_p4 }
  0x14   : > { %s518_s6 = sshll.u32 %s171_s22, 5  ;;  %s883_s7 = scalar_lea.sflag [#allocation6], %s169_s21 }
  0x15   : > { %s173_s4 = scalar_lea.vmem [#allocation5], %s534_s25  ;;  %s1029_s8 = smov 256  }
  0x16   : > { %s183_s5 = sshll.u32 %s173_s4, 4  ;;  %s1030_s9 = smov 16   ;;  %s184_s5 = int_to_ptr.vmem [resolvable:$true] %s183_s5 }
  0x17   : > { %s180_s28 = scalar_lea.hbm %s1035_s1, %s535_s23  ;;  %s892_s10 = sadd.s32 4294967295, %s797_s17  }
  0x18   : > { %s181_s29 = sshll.u32 %s180_s28, 4  ;;  %s513_s11 = sadd.s32 4294967294, %s797_s17   ;;  %s182_s29 = int_to_ptr.hbm [resolvable:$true] %s181_s29 }
  0x19   : > { %554 = dma.hbm_to_vmem [thread:$0]  (!%p879_p7), %s182_s29, 3840, %s184_s5, %s883_s7, %s1029_s8, %s1029_s8, %s1030_s9  }
  0x1a   : > { %p75_p8 = scmp.ne.s32.totalorder %s781_s13, %s777_s12  ;;  %p76_p9 = scmp.eq.s32.totalorder %s892_s10, 0 }
  0x1b   : > { %p129_p10 = scmp.eq.s32.totalorder %s892_s10, 1  ;;  %p135_p11 = scmp.eq.s32.totalorder %s513_s11, 1 }
  0x1c   : > { %p514_p12 = scmp.ge.s32.totalorder %s797_s17, 1  ;;  %p902_p13 = por %p76_p9, %p75_p8 }
  0x1d   : > { %p909_p0 = por %p129_p10, %p69_p1  ;;  %p913_p2 = por %p135_p11, %p75_p8 }
  0x1e   : > { %p142_p4 = scmp.lt.s32.totalorder %s797_s17, 3  ;;  %s1040_s0 = sld [smem:[#allocation13_spill]] }
  0x1f   : > { %s801_s27 = smov [#allocation2]   ;;  %s532_s29 = sshll.u32 %s793_s16, 5 }
  0x20   : > { %p921_p5 = pnand %p514_p12, %p142_p4  ;;  %s155_s28 = sshll.u32 %s801_s27, 4  ;;  %s156_s28 = int_to_ptr.vmem [resolvable:$true] %s155_s28 }
  0x21   : > { %s204_s11 = scalar_lea.hbm %s1027_s2, %s532_s29  ;;  %s197_s22 = scalar_lea.vmem [#allocation7], %s518_s6 }
  0x22   : > { %p547_p1 = pneg %p921_p5  ;;  %s207_s23 = sshll.u32 %s197_s22, 4  ;;  %s208_s23 = int_to_ptr.vmem [resolvable:$true] %s207_s23 }
  0x23   : > { %s205_s8 = sshll.u32 %s204_s11, 4  ;;  %s802_s9 = smov 128   ;;  %s206_s8 = int_to_ptr.hbm [resolvable:$true] %s205_s8 }
  0x24   : > { %s153_s25 = sshll.u32 %s1040_s0, 4  ;;  %p548_p6 = pnand %p547_p1, %p76_p9  ;;  %s154_s25 = int_to_ptr.hbm [resolvable:$true] %s153_s25 }
  0x25   : > { %s803_s0 = smov 8   ;;  %s1042_s1 = smov 16  }
  0x26   : > { %550 = dma.hbm_to_vmem [thread:$0]  (!%p548_p6), %s154_s25, 256, %s156_s28, [#allocation3], %s802_s9, %s802_s9, %s803_s0  }
  0x27   : > { %s1043_s18 = smov 256   ;;  %219 = sbr.rel (%p921_p5) target bundleno = 226 (0xe2), region = 32 }
  0x28   : > { %557 = dma.hbm_to_vmem [thread:$0]  (!%p879_p7), %s206_s8, 512, %s208_s23, %s883_s7, %s1043_s18, %s1043_s18, %s1042_s1  }
  0x2c   : > { %764 = dma.done.wait (%p76_p9), [#allocation3], 256  }
  0x2d   : > { %766 = vsyncadd (%p76_p9), [#allocation3], 4294967040  ;;  %s226_s0 = sand.u32 1, %s892_s10   ;;  %s947_s6 = sand.u32 1, %s781_s13  }
  0x2e   : > { %s536_s30 = smul.u32 240, %s947_s6  ;;  %s227_s9 = scalar_lea.sflag [#allocation6], %s226_s0 }
  0x30   : > { %s950_s25 = scalar_lea.vmem [#allocation5], %s536_s30 }
  0x31   : > { %768 = dma.done.wait (%p902_p13), %s227_s9, 4352  }
  0x32   : > { %770 = vsyncadd (%p902_p13), %s227_s9, 4294962944  ;;  %v303_v0 = vld [vmem:[%s950_s25 + $0xe0] sm:$0xff]  ;;  %vm325_vm0 = vcmask 1043456   ;;  %v304_v1 = vld [vmem:[%s950_s25 + $0xe8] sm:$0xff]  ;;  %vm321_vm1 = vcmask 982016   ;;  %s523_s1 = sshll.u32 %s947_s6, 5 }
  0x33   : > { %v299_v2 = vld [vmem:[%s950_s25 + $0xc0] sm:$0xff]  ;;  %v319_v3 = vpack.c.bf16 %v303_v0, %v303_v0  ;;  %v320_v4 = vpack.c.bf16 %v304_v1, %v304_v1  ;;  %v301_v5 = vld [vmem:[%s950_s25 + $0xd0] sm:$0xff]  ;;  %v300_v6 = vld [vmem:[%s950_s25 + $0xc8] sm:$0xff]  ;;  %s240_s18 = scalar_lea.vmem [#allocation7], %s523_s1  ;;  %s533_s7 = sshll.u32 %s789_s15, 5 }
  0x34   : > { %v302_v7 = vld [vmem:[%s950_s25 + $0xd8] sm:$0xff]  ;;  %v317_v10 = vpack.c.bf16 %v301_v5, %v299_v2  ;;  %v295_v12 = vld [vmem:[%s950_s25 + $0xa0] sm:$0xff]  ;;  %v297_v13 = vld [vmem:[%s950_s25 + $0xb0] sm:$0xff]  ;;  %s268_s8 = scalar_lea.vmem [#allocation8], %s523_s1  ;;  %s386_s26 = scalar_lea.hbm %s1028_s3, %s533_s7 }
  0x35   : > { %v327_v8 = vsel %vm325_vm0, %v319_v3, 0  ;;  %v330_v9 = vsel %vm325_vm0, %v320_v4, 0  ;;  %v318_v11 = vpack.c.bf16 %v302_v7, %v300_v6  ;;  %v296_v14 = vld [vmem:[%s950_s25 + $0xa8] sm:$0xff]  ;;  %v298_v15 = vld [vmem:[%s950_s25 + $0xb8] sm:$0xff]  ;;  %v315_v16 = vpack.c.bf16 %v297_v13, %v295_v12  ;;  %v291_v18 = vld [vmem:[%s950_s25 + $0x80] sm:$0xff]  ;;  %s387_s27 = sshll.u32 %s268_s8, 4  ;;  %s388_s27 = int_to_ptr.vmem [resolvable:$true] %s387_s27 }
  0x36   : > { %332 = vmatpush.bf16.msra.mxu0 %v327_v8  ;;  %346 = vmatpush.bf16.msra.mxu1 %v330_v9  ;;  %v316_v17 = vpack.c.bf16 %v298_v15, %v296_v14  ;;  %v293_v19 = vld [vmem:[%s950_s25 + $0x90] sm:$0xff]  ;;  %v292_v20 = vld [vmem:[%s950_s25 + $0x88] sm:$0xff]  ;;  %v294_v21 = vld [vmem:[%s950_s25 + $0x98] sm:$0xff]  ;;  %s389_s28 = sshll.u32 %s386_s26, 4  ;;  %s373_s15 = scalar_lea.sflag [#allocation4], %s947_s6  ;;  %s390_s28 = int_to_ptr.hbm [resolvable:$true] %s389_s28 }
  0x37   : > { %v313_v22 = vpack.c.bf16 %v293_v19, %v291_v18  ;;  %v314_v23 = vpack.c.bf16 %v294_v21, %v292_v20  ;;  %v287_v24 = vld [vmem:[%s950_s25 + $0x60] sm:$0xff]  ;;  %v289_v25 = vld [vmem:[%s950_s25 + $0x70] sm:$0xff]  ;;  %v288_v26 = vld [vmem:[%s950_s25 + $0x68] sm:$0xff]  ;;  %s725_s29 = sshra.s32 %s390_s28, 4  ;;  %s731_s22 = scalar_lea.hbm %s1028_s3, 64  ;;  %s726_s29 = int_to_ptr.hbm [resolvable:$true] %s725_s29 }
  0x38   : > { %v290_v27 = vld [vmem:[%s950_s25 + $0x78] sm:$0xff]  ;;  %v311_v28 = vpack.c.bf16 %v289_v25, %v287_v24  ;;  %v283_v30 = vld [vmem:[%s950_s25 + $0x40] sm:$0xff]  ;;  %v285_v31 = vld [vmem:[%s950_s25 + $0x50] sm:$0xff]  ;;  %s727_s4 = scalar_lea.hbm %s726_s29, 32  ;;  %p732_p10 = scmp.lt.s32.totalorder %s726_s29, %s1028_s3 }
  0x39   : > { %v312_v29 = vpack.c.bf16 %v290_v27, %v288_v26  ;;  %v284_v32 = vld [vmem:[%s950_s25 + $0x48] sm:$0xff]  ;;  %v286_v33 = vld [vmem:[%s950_s25 + $0x58] sm:$0xff]  ;;  %v309_v34 = vpack.c.bf16 %v285_v31, %v283_v30  ;;  %v279_v36 = vld [vmem:[%s950_s25 + $0x20] sm:$0xff]  ;;  %p728_p7 = scmp.ne.s32.totalorder %s726_s29, %s727_s4  ;;  %p733_p11 = scmp.lt.s32.totalorder %s731_s22, %s727_s4 }
  0x3a   : > { %333 = vmatpush.bf16.msra.mxu0 %v317_v10  ;;  %347 = vmatpush.bf16.msra.mxu1 %v318_v11  ;;  %v310_v35 = vpack.c.bf16 %v286_v33, %v284_v32  ;;  %v281_v37 = vld [vmem:[%s950_s25 + $0x30] sm:$0xff]  ;;  %v280_v38 = vld [vmem:[%s950_s25 + $0x28] sm:$0xff]  ;;  %v282_v39 = vld [vmem:[%s950_s25 + $0x38] sm:$0xff] }
  0x3b   : > { %v307_v40 = vpack.c.bf16 %v281_v37, %v279_v36  ;;  %v308_v41 = vpack.c.bf16 %v282_v39, %v280_v38  ;;  %v275_v42 = vld [vmem:[%s950_s25] sm:$0xff]  ;;  %v277_v43 = vld [vmem:[%s950_s25 + $0x10] sm:$0xff]  ;;  %v276_v44 = vld [vmem:[%s950_s25 + $0x8] sm:$0xff]  ;;  %p729_p8 = pnand %p728_p7, %p909_p0  ;;  %p734_p12 = por %p733_p11, %p732_p10 }
  0x3c   : > { %v278_v45 = vld [vmem:[%s950_s25 + $0x18] sm:$0xff]  ;;  %v305_v46 = vpack.c.bf16 %v277_v43, %v275_v42  ;;  %v272_v48 = vld [vmem:[#allocation2] sm:$0xff]  ;;  %v360_v51 = vld [vmem:[%s240_s18] sm:$0xff] }
  0x3d   : > { %v306_v47 = vpack.c.bf16 %v278_v45, %v276_v44  ;;  %v273_v49 = vld [vmem:[#allocation2 + $0x8] sm:$0xff]  ;;  %v361_v52 = vld [vmem:[%s240_s18 + $0x8] sm:$0xff]  ;;  %v362_v57 = vld [vmem:[%s240_s18 + $0x10] sm:$0xff]  ;;  %p730_p9 = pneg %p729_p8 }
  0x3e   : > { %334 = vmatpush.bf16.msra.mxu0 %v315_v16  ;;  %348 = vmatpush.bf16.msra.mxu1 %v316_v17  ;;  %v274_v50 = vpack.c.bf16 %v273_v49, %v272_v48  ;;  %v363_v58 = vld [vmem:[%s240_s18 + $0x18] sm:$0xff] }
  0x3f   : > { %p735_p13 = pnand %p734_p12, %p730_p9 }
  0x42   : > { %335 = vmatpush.bf16.msra.mxu0 %v313_v22  ;;  %349 = vmatpush.bf16.msra.mxu1 %v314_v23 }
  0x46   : > { %336 = vmatpush.bf16.msra.mxu0 %v311_v28  ;;  %350 = vmatpush.bf16.msra.mxu1 %v312_v29 }
  0x4a   : > { %337 = vmatpush.bf16.msra.mxu0 %v309_v34  ;;  %351 = vmatpush.bf16.msra.mxu1 %v310_v35 }
  0x4e   : > { %338 = vmatpush.bf16.msra.mxu0 %v307_v40  ;;  %352 = vmatpush.bf16.msra.mxu1 %v308_v41 }
  0x52   : > { %339 = vmatpush.bf16.msra.mxu0 %v305_v46  ;;  %353 = vmatpush.bf16.msra.mxu1 %v306_v47 }
  0x55   : > { %525 = vmatmul.msk.bf16.vlgmr.msra.gmra.mxu0 %vm321_vm1, %v274_v50  ;;  %526 = vmatmul.msk.bf16.vlgmr.msra.gmra.mxu1 %vm321_vm1, %v274_v50 }
  0xd2   : > { %v341_v53 = vpop.f32.mrf.mxu0  ;;  %v355_v54 = vpop.f32.mrf.mxu1 }
  0xd3   : > { %v364_v55 = vadd.f32 %v360_v51, %v341_v53  ;;  %v365_v56 = vadd.f32 %v361_v52, %v355_v54 }
  0xd5   : > { %368 = vst [vmem:[%s268_s8] sm:$0xff] %v364_v55 }
  0xd6   : > { %369 = vst [vmem:[%s268_s8 + $0x8] sm:$0xff] %v365_v56 }
  0xda   : > { %v343_v59 = vpop.f32.mrf.mxu0  ;;  %v357_v60 = vpop.f32.mrf.mxu1 }
  0xdb   : > { %v366_v61 = vadd.f32 %v362_v57, %v343_v59  ;;  %v367_v62 = vadd.f32 %v363_v58, %v357_v60 }
  0xdd   : > { %370 = vst [vmem:[%s268_s8 + $0x10] sm:$0xff] %v366_v61 }
  0xde   : > { %371 = vst [vmem:[%s268_s8 + $0x18] sm:$0xff] %v367_v62 }
  0xdf   : > { %738 = shalt.err (!%p735_p13)
}
  0xe0   : > { %s804_s6 = smov 256   ;;  %s805_s30 = smov 16  }
  0xe1   : > { %545 = dma.vmem_to_hbm [thread:$0]  (%p909_p0), %s388_s27, 512, %s390_s28, %s373_s15, %s804_s6, %s804_s6, %s805_s30  }
  0xe2 PF: > { %s404_s9 = sand.u32 1, %s777_s12   ;;  %p559_p4 = pnand %p516_p3, %p913_p2 }
  0xe3   : > { %s405_s25 = scalar_lea.sflag [#allocation4], %s404_s9 }
  0xe4   : > { %p560_p5 = pneg %p559_p4 }
  0xe6   : > { %772 = dma.done.wait (%p560_p5), %s405_s25, 512  }
  0xe7   : > { %774 = vsyncadd (%p560_p5), %s405_s25, 4294966784  ;;  %s20_s17 = sadd.s32 1, %s797_s17   ;;  %s1044_s20 = sld [smem:[#allocation12_spill]] }
  0xe8   : > { %p17_p1 = scmp.ge.s32.totalorder %s20_s17, 4   ;;  %s1045_s12 = smov %s781_s13 }
  0xe9   : > { %s1046_s13 = smov %s785_s14  ;;  %s1047_s14 = smov %s874_s24 }
  0xea   : > { %s1048_s15 = smov %s793_s16  ;;  %19 = sbr.rel (!%p17_p1) target bundleno = 10 (0xa), region = 93 }
  0xed   : > { %s1049_s16 = smov %s1044_s20 }
  0xef   :  { %411 = vsyncpa [#allocation3], 1 }
  0xf0   :  { %413 = vsyncpa [#allocation3 + $0x1], 1 }
  0xf1   :  { %414 = vsyncpa [#allocation6], 1 }
  0xf2   :  { %416 = vsyncpa [#allocation6 + $0x1], 1 }
  0xf3   :  { %417 = vsyncpa [#allocation4], 1 }
  0xf4   :  { %419 = vsyncpa [#allocation4 + $0x1], 1 }

</bundles_post_ra>
